<compile_context>
chip_gen: v5e
topology: v5e:2x2
jax: 0.10.0
libtpu: 0.0.40
codegen_flags: <defaults>
</compile_context>

<pallas_src>
import jax
import jax.numpy as jnp
from jax.experimental import pallas as pl
from jax.experimental.pallas import tpu as pltpu

LANES = 128
# 2048 rows * 128 lanes * 4 B = 1 MiB per f32 block; with 3 arrays double-
# buffered that is ~6 MiB of VMEM -> fits default scoped limits on v5e (16 MiB),
# v6e (32 MiB) and v7x (32 MiB scoped / 64 MiB physical).
MAX_BLOCK_ROWS = 2048


def _mse_with_logits_kernel(logits_ref, targets_ref, out_ref):
    x = logits_ref[...].astype(jnp.float32)
    t = targets_ref[...].astype(jnp.float32)

    # clamp(sigmoid(x), 1e-14, 1 - 1e-14)
    # NOTE: the upper clamp (1 - 1e-14) rounds to 1.0 in f32, matching a
    # float32 PyTorch run but not a float64 reference bit-for-bit.
    inputs = jnp.clip(jax.nn.sigmoid(x), 1e-14, 1.0 - 1e-14)

    d = inputs - t
    pos_loss = jnp.where(t == 1.0, d * d, 0.0)
    neg_loss = jnp.where(t == 0.0, 0.5 * inputs * inputs, 0.0)
    out_ref[...] = (pos_loss + neg_loss).astype(out_ref.dtype)


def mse_with_logits_loss(logits, targets):
    """Elementwise MSE-with-logits loss. logits/targets: any shape (e.g. NCHW).

    Output dtype == logits dtype when it is floating, else float32.
    """
    assert logits.shape == targets.shape
    orig_shape = logits.shape
    out_dtype = (logits.dtype if jnp.issubdtype(logits.dtype, jnp.floating)
                 else jnp.float32)

    n = logits.size
    pad = (LANES - n % LANES) % LANES

    lf = logits.reshape(-1)
    tf = targets.reshape(-1)
    if pad:
        # Rare path: flat size not lane-aligned. Pads at most 127 elements;
        # sigmoid(0) = 0.5, so the padded lanes are NaN-free and get sliced off.
        lf = jnp.pad(lf, (0, pad))
        tf = jnp.pad(tf, (0, pad))

    rows = (n + pad) // LANES
    # Full-array block when it fits, else 2048-row (1 MiB) blocks; 2048 is a
    # multiple of 8 so the (8,128) tiling constraint holds, and Pallas masks
    # the partial last block when block_rows does not divide rows.
    block_rows = rows if rows <= MAX_BLOCK_ROWS else MAX_BLOCK_ROWS
    grid = (pl.cdiv(rows, block_rows),)

    spec = pl.BlockSpec((block_rows, LANES), lambda i: (i, 0))

    bytes_accessed = n * (jnp.dtype(logits.dtype).itemsize
                          + jnp.dtype(targets.dtype).itemsize
                          + jnp.dtype(out_dtype).itemsize)
    cost = pl.CostEstimate(flops=10 * n, transcendentals=n,
                           bytes_accessed=bytes_accessed)

    out = pl.pallas_call(
        _mse_with_logits_kernel,
        out_shape=jax.ShapeDtypeStruct((rows, LANES), out_dtype),
        grid_spec=pltpu.PrefetchScalarGridSpec(
            num_scalar_prefetch=0,
            grid=grid,
            in_specs=[spec, spec],
            out_specs=spec,
        ),
        compiler_params=pltpu.CompilerParams(
            dimension_semantics=("parallel",),
        ),
        cost_estimate=cost,
    )(lf.reshape(rows, LANES), tf.reshape(rows, LANES))

    if pad:
        out = out.reshape(-1)[:n]
    return out.reshape(orig_shape)


def _reference(logits, targets):
    inputs = jnp.clip(jax.nn.sigmoid(logits.astype(jnp.float32)), 1e-14, 1.0 - 1e-14)
    t = targets.astype(jnp.float32)
    pos_id = (t == 1.0).astype(jnp.float32)
    neg_id = (t == 0.0).astype(jnp.float32)
    return pos_id * (inputs - t) ** 2 + 0.5 * neg_id * inputs ** 2


if __name__ == "__main__":
    key = jax.random.PRNGKey(0)
    k1, k2, k3, k4 = jax.random.split(key, 4)

    # NCHW-style shapes consistent with a YOLO objectness map.
    B, C, H, W = 2, 4, 16, 16
    logits = jax.random.normal(k1, (B, C, H, W), dtype=jnp.float32)
    # targets are mostly 0/1 (objectness), with a few "ignore" values (-1) mixed in.
    raw = jax.random.uniform(k2, (B, C, H, W))
    targets = jnp.where(raw > 0.8, 1.0, jnp.where(raw < 0.05, -1.0, 0.0)).astype(jnp.float32)

    loss = mse_with_logits_loss(logits, targets)
    jax.block_until_ready(loss)

    ref = _reference(logits, targets)
    assert loss.shape == logits.shape
    assert loss.dtype == logits.dtype
    assert jnp.allclose(loss, ref, atol=1e-6, rtol=1e-6), "mismatch vs reference"

    # Also exercise the non-lane-aligned (pad) path with a small odd shape.
    l2 = jax.random.normal(k3, (3, 5, 7), dtype=jnp.float32)
    r2 = jax.random.uniform(k4, (3, 5, 7))
    t2 = jnp.where(r2 > 0.7, 1.0, 0.0).astype(jnp.float32)
    out2 = mse_with_logits_loss(l2, t2)
    jax.block_until_ready(out2)
    assert jnp.allclose(out2, _reference(l2, t2), atol=1e-6, rtol=1e-6), "pad-path mismatch"

    print("KERNEL_OK")
</pallas_src>

<mosaic_0001>
module attributes {stable_mosaic.version = 11 : i64} {
  func.func @_mse_with_logits_kernel(%arg0: i32, %arg1: memref<16x128xf32, #tpu.memory_space<vmem>>, %arg2: memref<16x128xf32, #tpu.memory_space<vmem>>, %arg3: memref<16x128xf32, #tpu.memory_space<vmem>>) attributes {dimension_semantics = [#tpu.dimension_semantics<parallel>], iteration_bounds = array<i64: 1>, scalar_prefetch = 0 : i64, scratch_operands = 0 : i64, tpu.core_type = #tpu.core_type<tc>, window_params = [{transform_indices = @transform_0, window_bounds = array<i64: 16, 128>}, {transform_indices = @transform_1, window_bounds = array<i64: 16, 128>}, {transform_indices = @transform_2, window_bounds = array<i64: 16, 128>}]} {
    %c0 = arith.constant 0 : index
    %c0_0 = arith.constant 0 : index
    %0 = vector.load %arg1[%c0, %c0_0] : memref<16x128xf32, #tpu.memory_space<vmem>>, vector<16x128xf32>
    %c0_1 = arith.constant 0 : index
    %c0_2 = arith.constant 0 : index
    %1 = vector.load %arg2[%c0_1, %c0_2] : memref<16x128xf32, #tpu.memory_space<vmem>>, vector<16x128xf32>
    %2 = arith.negf %0 : vector<16x128xf32>
    %3 = math.exp %2 : vector<16x128xf32>
    %cst = arith.constant 1.000000e+00 : f32
    %4 = vector.broadcast %cst : f32 to vector<16x128xf32>
    %5 = arith.addf %4, %3 : vector<16x128xf32>
    %6 = arith.divf %4, %5 : vector<16x128xf32>
    %cst_3 = arith.constant 9.99999982E-15 : f32
    %cst_4 = arith.constant 1.000000e+00 : f32
    %7 = vector.broadcast %cst_3 : f32 to vector<16x128xf32>
    %8 = arith.maximumf %7, %6 : vector<16x128xf32>
    %9 = vector.broadcast %cst_4 : f32 to vector<16x128xf32>
    %10 = arith.minimumf %9, %8 : vector<16x128xf32>
    %11 = arith.subf %10, %1 : vector<16x128xf32>
    %cst_5 = arith.constant 1.000000e+00 : f32
    %12 = vector.broadcast %cst_5 : f32 to vector<16x128xf32>
    %13 = arith.cmpf oeq, %1, %12 : vector<16x128xf32>
    %14 = arith.mulf %11, %11 : vector<16x128xf32>
    %cst_6 = arith.constant 0.000000e+00 : f32
    %15 = vector.broadcast %cst_6 : f32 to vector<16x128xf32>
    %16 = arith.select %13, %14, %15 : vector<16x128xi1>, vector<16x128xf32>
    %cst_7 = arith.constant 0.000000e+00 : f32
    %17 = vector.broadcast %cst_7 : f32 to vector<16x128xf32>
    %18 = arith.cmpf oeq, %1, %17 : vector<16x128xf32>
    %cst_8 = arith.constant 5.000000e-01 : f32
    %19 = vector.broadcast %cst_8 : f32 to vector<16x128xf32>
    %20 = arith.mulf %19, %10 : vector<16x128xf32>
    %21 = arith.mulf %20, %10 : vector<16x128xf32>
    %cst_9 = arith.constant 0.000000e+00 : f32
    %22 = vector.broadcast %cst_9 : f32 to vector<16x128xf32>
    %23 = arith.select %18, %21, %22 : vector<16x128xi1>, vector<16x128xf32>
    %24 = arith.addf %16, %23 : vector<16x128xf32>
    %c0_10 = arith.constant 0 : index
    %c0_11 = arith.constant 0 : index
    %25 = vector.load %arg3[%c0_10, %c0_11] : memref<16x128xf32, #tpu.memory_space<vmem>>, vector<16x128xf32>
    tpu.vector_store %arg3[%c0_10, %c0_11], %24 {strides = array<i32>} : memref<16x128xf32, #tpu.memory_space<vmem>>, vector<16x128xf32>,
    return
  }
  func.func @transform_0(%arg0: i32) -> (i32, i32) {
    %c0_i32 = arith.constant 0 : i32
    %c0_i32_0 = arith.constant 0 : i32
    return %arg0, %c0_i32 : i32, i32
  }
  func.func @transform_1(%arg0: i32) -> (i32, i32) {
    %c0_i32 = arith.constant 0 : i32
    %c0_i32_0 = arith.constant 0 : i32
    return %arg0, %c0_i32 : i32, i32
  }
  func.func @transform_2(%arg0: i32) -> (i32, i32) {
    %c0_i32 = arith.constant 0 : i32
    %c0_i32_0 = arith.constant 0 : i32
    return %arg0, %c0_i32 : i32, i32
  }
}

</mosaic_0001>

<bundles_post_ra>
// kernel: tpu_custom_call.1
= control target key start
LH: loop header
LB: loop body
LE: loop exit
PB: predicated region body
PF: predicated region fallthrough
CT: control target
= control target key end

     0   :  { %7 = vsyncpa [#allocation3], 0  ;;  %s261_s0 = inlined_call_operand.hbm [shape: f32[16,128], index: 0, kind: input, shape index: {}]   ;;  %s262_s1 = inlined_call_operand.hbm [shape: f32[16,128], index: 1, kind: input, shape index: {}]   ;;  %s263_s2 = inlined_call_operand.hbm [shape: f32[16,128], index: 2, kind: output, shape index: {}]  }
   0x1   :  { %8 = vsyncpa [#allocation6], 0 }
   0x2   :  { %9 = vsyncpa [#allocation4], 0  ;;  %s14_s11 = sshll.u32 %s261_s0, 4  ;;  %s223_s12 = smov [#allocation2]   ;;  %s15_s11 = int_to_ptr.hbm [resolvable:$true] %s14_s11 }
   0x3   :  { %s16_s13 = sshll.u32 %s223_s12, 4  ;;  %s27_s16 = sshll.u32 %s262_s1, 4  ;;  %s17_s13 = int_to_ptr.vmem [resolvable:$true] %s16_s13  ;;  %s28_s16 = int_to_ptr.hbm [resolvable:$true] %s27_s16 }
   0x4   :  { %s224_s17 = smov 128   ;;  %s225_s18 = smov 8  }
   0x5   :  { %22 = dma.hbm_to_vmem [thread:$0]  %s15_s11, 256, %s17_s13, [#allocation3], %s224_s17, %s224_s17, %s225_s18  }
   0x6   :  { %s226_s19 = smov [#allocation5]  }
   0x7   :  { %s29_s20 = sshll.u32 %s226_s19, 4  ;;  %s30_s20 = int_to_ptr.vmem [resolvable:$true] %s29_s20 }
   0x8   :  { %35 = dma.hbm_to_vmem [thread:$0]  %s28_s16, 256, %s30_s20, [#allocation6], %s224_s17, %s224_s17, %s225_s18  }
   0x9   :  { %217 = dma.done.wait [#allocation3], 256  }
   0xa   :  { %218 = vsyncadd [#allocation3], 4294967040 }
   0xb   :  { %219 = dma.done.wait [#allocation6], 256  }
   0xc   :  { %220 = vsyncadd [#allocation6], 4294967040  ;;  %v44_v0 = vld [vmem:[#allocation2] sm:$0xff]  ;;  %v45_v1 = vld [vmem:[#allocation2 + $0x8] sm:$0xff]  ;;  %s227_s0 = smov [#allocation7]   ;;  %s116_s23 = sshll.u32 %s263_s2, 4  ;;  %s117_s23 = int_to_ptr.hbm [resolvable:$true] %s116_s23 }
   0xd   :  { %v130_v2 = vmul.f32 -1.442695, %v44_v0  ;;  %v131_v3 = vmul.f32 -1.442695, %v45_v1  ;;  %v46_v29 = vld [vmem:[#allocation5] sm:$0xff]  ;;  %v47_v32 = vld [vmem:[#allocation5 + $0x8] sm:$0xff] }
   0xe   :  { %vm92_vm8 = vcmp.eq.f32.partialorder %v46_v29, 1.0  ;;  %vm98_vm9 = vcmp.eq.f32.partialorder %v46_v29, 0.0  ;;  %vm93_vm10 = vcmp.eq.f32.partialorder %v47_v32, 1.0  ;;  %vm99_vm11 = vcmp.eq.f32.partialorder %v47_v32, 0.0  ;;  %s114_s1 = sshll.u32 %s227_s0, 4  ;;  %s115_s1 = int_to_ptr.vmem [resolvable:$true] %s114_s1 }
   0xf   :  { %137 = vpow2.f32 %v130_v2 }
  0x10   :  { %139 = vpow2.f32 %v131_v3 }
  0x15   :  { %v138_v4 = vpop.eup %137 }
  0x16   :  { %v140_v5 = vpop.eup %139  ;;  %v54_v6 = vadd.f32 1.0, %v138_v4 }
  0x17   :  { %v55_v7 = vadd.f32 1.0, %v140_v5 }
  0x18   :  { %141 = vrcp.f32 %v54_v6  ;;  %vm61_vm0 = vweird.f32 %v54_v6  ;;  %v67_v11 = vand.u32 2147483648, %v54_v6  ;;  %v65_v14 = vand.u32 2147483647, %v54_v6 }
  0x19   :  { %143 = vrcp.f32 %v55_v7  ;;  %v82_v15 = vand.u32 2147483648, %v55_v7  ;;  %vm76_vm2 = vweird.f32 %v55_v7  ;;  %v80_v17 = vand.u32 2147483647, %v55_v7 }
  0x1a   :  { %v68_v19 = vor.u32 1.1754944e-38, %v67_v11  ;;  %vm66_vm5 = vcmp.eq.f32.partialorder %v65_v14, 8.507059e+37 }
  0x1b   :  { %v83_v22 = vor.u32 1.1754944e-38, %v82_v15  ;;  %vm81_vm7 = vcmp.eq.f32.partialorder %v80_v17, 8.507059e+37 }
  0x1e   :  { %v142_v8 = vpop.eup %141 }
  0x1f   :  { %v144_v9 = vpop.eup %143  ;;  %v57_v10 = vmul.f32 %v142_v8, %v54_v6  ;;  %vm62_vm1 = vweird.f32 %v142_v8 }
  0x20   :  { %v72_v12 = vmul.f32 %v144_v9, %v55_v7  ;;  %vm77_vm3 = vweird.f32 %v144_v9  ;;  %vm63_vm4 = vmor %vm61_vm0, %vm62_vm1 }
  0x21   :  { %v58_v13 = vsub.f32 1.0, %v57_v10  ;;  %vm78_vm6 = vmor %vm76_vm2, %vm77_vm3 }
  0x22   :  { %v73_v16 = vsub.f32 1.0, %v72_v12 }
  0x23   :  { %v59_v18 = vmul.f32 %v142_v8, %v58_v13 }
  0x24   :  { %v74_v20 = vmul.f32 %v144_v9, %v73_v16 }
  0x25   :  { %v60_v21 = vadd.f32 %v142_v8, %v59_v18 }
  0x26   :  { %v75_v23 = vadd.f32 %v144_v9, %v74_v20 }
  0x27   :  { %v64_v24 = vsel %vm63_vm4, %v142_v8, %v60_v21 }
  0x28   :  { %v69_v25 = vsel %vm66_vm5, %v68_v19, %v64_v24  ;;  %v79_v26 = vsel %vm78_vm6, %v144_v9, %v75_v23 }
  0x29   :  { %v86_v27 = vmax.f32 %v69_v25, 1e-14  ;;  %v84_v28 = vsel %vm81_vm7, %v83_v22, %v79_v26 }
  0x2a   :  { %v87_v30 = vmax.f32 %v84_v28, 1e-14 }
  0x2b   :  { %v88_v31 = vmin.f32 %v86_v27, 1.0 }
  0x2c   :  { %v89_v33 = vmin.f32 %v87_v30, 1.0 }
  0x2d   :  { %v90_v34 = vsub.f32 %v88_v31, %v46_v29  ;;  %v100_v35 = vmul.f32 0.5, %v88_v31 }
  0x2e   :  { %v91_v36 = vsub.f32 %v89_v33, %v47_v32  ;;  %v101_v37 = vmul.f32 0.5, %v89_v33 }
  0x2f   :  { %v94_v38 = vmul.f32 %v90_v34, %v90_v34  ;;  %v102_v39 = vmul.f32 %v100_v35, %v88_v31 }
  0x30   :  { %v95_v40 = vmul.f32 %v91_v36, %v91_v36  ;;  %v103_v41 = vmul.f32 %v101_v37, %v89_v33 }
  0x31   :  { %v96_v42 = vsel %vm92_vm8, %v94_v38, 0.0  ;;  %v104_v43 = vsel %vm98_vm9, %v102_v39, 0.0 }
  0x32   :  { %v106_v44 = vadd.f32 %v104_v43, %v96_v42  ;;  %v97_v45 = vsel %vm93_vm10, %v95_v40, 0.0  ;;  %v105_v46 = vsel %vm99_vm11, %v103_v41, 0.0 }
  0x33   :  { %v107_v47 = vadd.f32 %v105_v46, %v97_v45 }
  0x34   :  { %108 = vst [vmem:[#allocation7] sm:$0xff] %v106_v44 }
  0x35   :  { %109 = vst [vmem:[#allocation7 + $0x8] sm:$0xff] %v107_v47 }
  0x36   :  { %122 = dma.vmem_to_hbm [thread:$0]  %s115_s1, 256, %s117_s23, [#allocation4], %s224_s17, %s224_s17, %s225_s18  }
  0x37   :  { %221 = dma.done.wait [#allocation4], 256  }
  0x38   :  { %222 = vsyncadd [#allocation4], 4294967040 }
  0x39   :  { %127 = vsyncpa [#allocation3], 1 }
  0x3a   :  { %128 = vsyncpa [#allocation6], 1 }
  0x3b   :  { %129 = vsyncpa [#allocation4], 1 }

</bundles_post_ra>
